<compile_context>
chip_gen: v6e
topology: v6e:2x2x1
jax: 0.10.0
libtpu: 0.0.40
codegen_flags: <defaults>
</compile_context>

<pallas_src>
import jax
import jax.numpy as jnp
from jax.experimental import pallas as pl
from jax.experimental.pallas import tpu as pltpu


def _mhfa_kernel(x_ref, w1_ref, b1_ref, w2_ref, b2_ref, wm_ref, bm_ref, o_ref):
    """One (C, TP) pixel tile of the MultiHeadFreqAttention forward pass.

    x_ref : (C, TP)        input pixels (channels on sublanes, pixels on lanes)
    w1_ref: (3*C8, C)      concatenated first 1x1 conv weights (all heads)
    b1_ref: (3*C8, 1)      concatenated first 1x1 conv biases
    w2_ref: (3, 3*C8)      block-diagonal second 1x1 conv weights
    b2_ref: (3,)   SMEM    second conv biases (one per head)
    wm_ref: (3,)   SMEM    3->1 mixing conv weights
    bm_ref: (1,)   SMEM    3->1 mixing conv bias
    o_ref : (C, TP)        output = x * attention
    """
    x = x_ref[...]  # (C, TP) f32

    # Fused first 1x1 convs for all 3 heads: (3*C8, C) @ (C, TP) + bias.
    hid = jnp.dot(w1_ref[...], x, preferred_element_type=jnp.float32)
    hid = hid + b1_ref[...]                      # (3*C8, TP)
    # LeakyReLU (PyTorch default negative_slope = 0.01)
    hid = jnp.where(hid >= 0.0, hid, 0.01 * hid)

    # Fused second 1x1 convs via block-diagonal weight: (3, 3*C8) @ (3*C8, TP).
    s = jnp.dot(w2_ref[...], hid, preferred_element_type=jnp.float32)  # (3, TP)

    # Per-head bias (SMEM scalar) + sigmoid.
    h0 = jax.nn.sigmoid(s[0:1, :] + b2_ref[0])   # (1, TP)
    h1 = jax.nn.sigmoid(s[1:2, :] + b2_ref[1])
    h2 = jax.nn.sigmoid(s[2:3, :] + b2_ref[2])

    # multi_head_attn: 1x1 conv over the 3 heads (3 -> 1) + sigmoid.
    a = jax.nn.sigmoid(h0 * wm_ref[0] + h1 * wm_ref[1] + h2 * wm_ref[2]
                       + bm_ref[0])              # (1, TP)

    # Broadcast multiply over the channel (sublane) axis -> lane-dense store.
    o_ref[...] = x * a


def _pick_tile_p(hw, want):
    """Largest pixel tile <= want that keeps the lane dim legal (multiple of
    128 dividing hw, or the full hw)."""
    if hw <= want:
        return hw
    start = want - (want % 128)
    for cand in range(start, 0, -128):
        if hw % cand == 0:
            return cand
    return hw  # fallback: full spatial extent (always legal)


def multi_head_freq_attention(x_nchw, params, *, tile_p=2048):
    """x_nchw: (N, C, H, W) float32. Returns (N, C, H, W)."""
    w1, b1, w2, b2, wm, bm = params
    N, C, H, W = x_nchw.shape
    assert C % 8 == 0, "channel must be a multiple of 8 (C // 8 hidden width)"
    C8 = C // 8
    HW = H * W
    tp = _pick_tile_p(HW, tile_p)

    # Free reshape: NCHW -> (N, C, H*W). No transposes needed.
    x3 = x_nchw.reshape(N, C, HW)

    # --- one-time tiny weight prep (wrapper side) ---------------------------
    # First convs: per-head (C8, C) stacked -> (3*C8, C); biases -> (3*C8, 1).
    w1_cat = w1.reshape(3 * C8, C)
    b1_cat = b1.reshape(3 * C8, 1)
    # Second convs: per-head (C8,) row placed block-diagonally -> (3, 3*C8).
    eye3 = jnp.eye(3, dtype=w2.dtype)
    w2_bd = (eye3[:, :, None] * w2[None, :, :]).reshape(3, 3 * C8)

    grid = (N, HW // tp)

    out3 = pl.pallas_call(
        _mhfa_kernel,
        out_shape=jax.ShapeDtypeStruct((N, C, HW), jnp.float32),
        grid_spec=pltpu.PrefetchScalarGridSpec(
            num_scalar_prefetch=0,
            grid=grid,
            in_specs=[
                # x tile: batch dim squeezed, channels on sublanes, pixels on lanes.
                pl.BlockSpec((None, C, tp), lambda n, p: (n, 0, p)),
                pl.BlockSpec((3 * C8, C), lambda n, p: (0, 0)),   # w1_cat
                pl.BlockSpec((3 * C8, 1), lambda n, p: (0, 0)),   # b1_cat
                pl.BlockSpec((3, 3 * C8), lambda n, p: (0, 0)),   # w2_bd
                pl.BlockSpec(memory_space=pltpu.MemorySpace.SMEM),  # b2
                pl.BlockSpec(memory_space=pltpu.MemorySpace.SMEM),  # wm
                pl.BlockSpec(memory_space=pltpu.MemorySpace.SMEM),  # bm
            ],
            out_specs=pl.BlockSpec((None, C, tp), lambda n, p: (n, 0, p)),
        ),
        compiler_params=pltpu.CompilerParams(
            dimension_semantics=("parallel", "parallel")),
    )(x3, w1_cat, b1_cat, w2_bd, b2, wm, bm)

    return out3.reshape(N, C, H, W)


def init_params(key, channel):
    """Deterministic synthetic parameters matching the PyTorch module shapes."""
    C, C8 = channel, channel // 8
    ks = jax.random.split(key, 12)
    scale = 0.1
    # attn_head_i first conv: Conv2d(C, C8, 1) weight (C8, C, 1, 1) -> (C8, C)
    w1 = jnp.stack([scale * jax.random.normal(ks[i], (C8, C), jnp.float32)
                    for i in range(3)])                        # (3, C8, C)
    b1 = jnp.stack([scale * jax.random.normal(ks[3 + i], (C8,), jnp.float32)
                    for i in range(3)])                        # (3, C8)
    # attn_head_i second conv: Conv2d(C8, 1, 1) weight (1, C8, 1, 1) -> (C8,)
    w2 = jnp.stack([scale * jax.random.normal(ks[6 + i], (C8,), jnp.float32)
                    for i in range(3)])                        # (3, C8)
    b2 = scale * jax.random.normal(ks[9], (3,), jnp.float32)   # (3,)
    # multi_head_attn: Conv2d(3, 1, 1) weight (1, 3, 1, 1) -> (3,), bias (1,)
    wm = scale * jax.random.normal(ks[10], (3,), jnp.float32)  # (3,)
    bm = scale * jax.random.normal(ks[11], (1,), jnp.float32)  # (1,)
    return (w1, b1, w2, b2, wm, bm)


def _reference(x_nchw, params):
    """Plain-JAX reference of the PyTorch forward for sanity checking."""
    w1, b1, w2, b2, wm, bm = params
    N, C, H, W = x_nchw.shape
    x = x_nchw.reshape(N, C, H * W)                               # (N, C, P)
    heads = []
    for h in range(3):
        hid = jnp.einsum('oc,ncp->nop', w1[h], x) + b1[h][None, :, None]
        hid = jnp.where(hid >= 0, hid, 0.01 * hid)
        s = jnp.einsum('c,ncp->np', w2[h], hid) + b2[h]           # (N, P)
        heads.append(jax.nn.sigmoid(s))
    a = jax.nn.sigmoid(wm[0] * heads[0] + wm[1] * heads[1]
                       + wm[2] * heads[2] + bm[0])                # (N, P)
    out = x * a[:, None, :]
    return out.reshape(N, C, H, W)


if __name__ == "__main__":
    key = jax.random.PRNGKey(0)
    k_x, k_p = jax.random.split(key)

    N, C, H, W = 2, 16, 16, 16   # channel must be a multiple of 8
    x = jax.random.normal(k_x, (N, C, H, W), jnp.float32)
    params = init_params(k_p, C)

    out = multi_head_freq_attention(x, params, tile_p=2048)
    out = jax.block_until_ready(out)

    ref = _reference(x, params)
    assert out.shape == (N, C, H, W)
    assert jnp.allclose(out, ref, atol=1e-5, rtol=1e-5)

    print("KERNEL_OK")
</pallas_src>

<mosaic_0001>
module attributes {stable_mosaic.version = 11 : i64} {
  func.func @_mhfa_kernel(%arg0: i32, %arg1: i32, %arg2: memref<1x16x256xf32, #tpu.memory_space<vmem>>, %arg3: memref<6x16xf32, #tpu.memory_space<vmem>>, %arg4: memref<6x1xf32, #tpu.memory_space<vmem>>, %arg5: memref<3x6xf32, #tpu.memory_space<vmem>>, %arg6: memref<3xf32, #tpu.memory_space<smem>>, %arg7: memref<3xf32, #tpu.memory_space<smem>>, %arg8: memref<1xf32, #tpu.memory_space<smem>>, %arg9: memref<1x16x256xf32, #tpu.memory_space<vmem>>) attributes {dimension_semantics = [#tpu.dimension_semantics<parallel>, #tpu.dimension_semantics<parallel>], iteration_bounds = array<i64: 2, 1>, scalar_prefetch = 0 : i64, scratch_operands = 0 : i64, tpu.core_type = #tpu.core_type<tc>, window_params = [{transform_indices = @transform_0, window_bounds = array<i64: 1, 16, 256>}, {pipeline_mode = #tpu.pipeline_mode<synchronous>, transform_indices = @transform_1, window_bounds = array<i64: 6, 16>}, {pipeline_mode = #tpu.pipeline_mode<synchronous>, transform_indices = @transform_2, window_bounds = array<i64: 6, 1>}, {pipeline_mode = #tpu.pipeline_mode<synchronous>, transform_indices = @transform_3, window_bounds = array<i64: 3, 6>}, {transform_indices = @transform_4, window_bounds = array<i64: 3>}, {transform_indices = @transform_5, window_bounds = array<i64: 3>}, {transform_indices = @transform_6, window_bounds = array<i64: 1>}, {transform_indices = @transform_7, window_bounds = array<i64: 1, 16, 256>}]} {
    %c0 = arith.constant 0 : index
    %c0_0 = arith.constant 0 : index
    %c0_1 = arith.constant 0 : index
    %0 = vector.load %arg2[%c0, %c0_0, %c0_1] : memref<1x16x256xf32, #tpu.memory_space<vmem>>, vector<1x16x256xf32>
    %1 = vector.shape_cast %0 : vector<1x16x256xf32> to vector<16x256xf32>
    %c0_2 = arith.constant 0 : index
    %c0_3 = arith.constant 0 : index
    %2 = vector.load %arg3[%c0_2, %c0_3] : memref<6x16xf32, #tpu.memory_space<vmem>>, vector<6x16xf32>
    %cst = arith.constant dense<0.000000e+00> : vector<6x256xf32>
    %3 = tpu.matmul %2, %1, %cst {dimension_numbers = #tpu.dot_dimension_numbers<[1], [0], [0], [1], [0, 0, 1, 1], [], []>} : vector<6x16xf32>, vector<16x256xf32>, vector<6x256xf32> -> vector<6x256xf32>
    %c0_4 = arith.constant 0 : index
    %c0_5 = arith.constant 0 : index
    %4 = vector.load %arg4[%c0_4, %c0_5] : memref<6x1xf32, #tpu.memory_space<vmem>>, vector<6x1xf32>
    %5 = vector.broadcast %4 : vector<6x1xf32> to vector<6x256xf32>
    %6 = arith.addf %3, %5 : vector<6x256xf32>
    %cst_6 = arith.constant 0.000000e+00 : f32
    %7 = vector.broadcast %cst_6 : f32 to vector<6x256xf32>
    %8 = arith.cmpf oge, %6, %7 : vector<6x256xf32>
    %cst_7 = arith.constant 0.00999999977 : f32
    %9 = vector.broadcast %cst_7 : f32 to vector<6x256xf32>
    %10 = arith.mulf %9, %6 : vector<6x256xf32>
    %11 = arith.select %8, %6, %10 : vector<6x256xi1>, vector<6x256xf32>
    %c0_8 = arith.constant 0 : index
    %c0_9 = arith.constant 0 : index
    %12 = vector.load %arg5[%c0_8, %c0_9] : memref<3x6xf32, #tpu.memory_space<vmem>>, vector<3x6xf32>
    %cst_10 = arith.constant dense<0.000000e+00> : vector<3x256xf32>
    %13 = tpu.matmul %12, %11, %cst_10 {dimension_numbers = #tpu.dot_dimension_numbers<[1], [0], [0], [1], [0, 0, 1, 1], [], []>} : vector<3x6xf32>, vector<6x256xf32>, vector<3x256xf32> -> vector<3x256xf32>
    %14 = vector.extract_strided_slice %13 {offsets = [0, 0], sizes = [1, 256], strides = [1, 1]} : vector<3x256xf32> to vector<1x256xf32>
    %c0_11 = arith.constant 0 : index
    %15 = memref.load %arg6[%c0_11] : memref<3xf32, #tpu.memory_space<smem>>
    %16 = vector.broadcast %15 : f32 to vector<1x256xf32>
    %17 = arith.addf %14, %16 : vector<1x256xf32>
    %18 = arith.negf %17 : vector<1x256xf32>
    %19 = math.exp %18 : vector<1x256xf32>
    %cst_12 = arith.constant 1.000000e+00 : f32
    %20 = vector.broadcast %cst_12 : f32 to vector<1x256xf32>
    %21 = arith.addf %20, %19 : vector<1x256xf32>
    %22 = arith.divf %20, %21 : vector<1x256xf32>
    %23 = vector.extract_strided_slice %13 {offsets = [1, 0], sizes = [1, 256], strides = [1, 1]} : vector<3x256xf32> to vector<1x256xf32>
    %c1 = arith.constant 1 : index
    %24 = memref.load %arg6[%c1] : memref<3xf32, #tpu.memory_space<smem>>
    %25 = vector.broadcast %24 : f32 to vector<1x256xf32>
    %26 = arith.addf %23, %25 : vector<1x256xf32>
    %27 = arith.negf %26 : vector<1x256xf32>
    %28 = math.exp %27 : vector<1x256xf32>
    %cst_13 = arith.constant 1.000000e+00 : f32
    %29 = vector.broadcast %cst_13 : f32 to vector<1x256xf32>
    %30 = arith.addf %29, %28 : vector<1x256xf32>
    %31 = arith.divf %29, %30 : vector<1x256xf32>
    %32 = vector.extract_strided_slice %13 {offsets = [2, 0], sizes = [1, 256], strides = [1, 1]} : vector<3x256xf32> to vector<1x256xf32>
    %c2 = arith.constant 2 : index
    %33 = memref.load %arg6[%c2] : memref<3xf32, #tpu.memory_space<smem>>
    %34 = vector.broadcast %33 : f32 to vector<1x256xf32>
    %35 = arith.addf %32, %34 : vector<1x256xf32>
    %36 = arith.negf %35 : vector<1x256xf32>
    %37 = math.exp %36 : vector<1x256xf32>
    %cst_14 = arith.constant 1.000000e+00 : f32
    %38 = vector.broadcast %cst_14 : f32 to vector<1x256xf32>
    %39 = arith.addf %38, %37 : vector<1x256xf32>
    %40 = arith.divf %38, %39 : vector<1x256xf32>
    %c0_15 = arith.constant 0 : index
    %41 = memref.load %arg7[%c0_15] : memref<3xf32, #tpu.memory_space<smem>>
    %42 = vector.broadcast %41 : f32 to vector<1x256xf32>
    %43 = arith.mulf %22, %42 : vector<1x256xf32>
    %c1_16 = arith.constant 1 : index
    %44 = memref.load %arg7[%c1_16] : memref<3xf32, #tpu.memory_space<smem>>
    %45 = vector.broadcast %44 : f32 to vector<1x256xf32>
    %46 = arith.mulf %31, %45 : vector<1x256xf32>
    %47 = arith.addf %43, %46 : vector<1x256xf32>
    %c2_17 = arith.constant 2 : index
    %48 = memref.load %arg7[%c2_17] : memref<3xf32, #tpu.memory_space<smem>>
    %49 = vector.broadcast %48 : f32 to vector<1x256xf32>
    %50 = arith.mulf %40, %49 : vector<1x256xf32>
    %51 = arith.addf %47, %50 : vector<1x256xf32>
    %c0_18 = arith.constant 0 : index
    %52 = memref.load %arg8[%c0_18] : memref<1xf32, #tpu.memory_space<smem>>
    %53 = vector.broadcast %52 : f32 to vector<1x256xf32>
    %54 = arith.addf %51, %53 : vector<1x256xf32>
    %55 = arith.negf %54 : vector<1x256xf32>
    %56 = math.exp %55 : vector<1x256xf32>
    %cst_19 = arith.constant 1.000000e+00 : f32
    %57 = vector.broadcast %cst_19 : f32 to vector<1x256xf32>
    %58 = arith.addf %57, %56 : vector<1x256xf32>
    %59 = arith.divf %57, %58 : vector<1x256xf32>
    %60 = vector.broadcast %59 : vector<1x256xf32> to vector<16x256xf32>
    %61 = arith.mulf %1, %60 : vector<16x256xf32>
    %c0_20 = arith.constant 0 : index
    %c0_21 = arith.constant 0 : index
    %c0_22 = arith.constant 0 : index
    %62 = vector.load %arg9[%c0_20, %c0_21, %c0_22] : memref<1x16x256xf32, #tpu.memory_space<vmem>>, vector<1x16x256xf32>
    %63 = vector.shape_cast %62 : vector<1x16x256xf32> to vector<16x256xf32>
    %64 = vector.shape_cast %61 : vector<16x256xf32> to vector<1x16x256xf32>
    tpu.vector_store %arg9[%c0_20, %c0_21, %c0_22], %64 {strides = array<i32>} : memref<1x16x256xf32, #tpu.memory_space<vmem>>, vector<1x16x256xf32>,
    return
  }
  func.func @transform_0(%arg0: i32, %arg1: i32) -> (i32, i32, i32) {
    %c0_i32 = arith.constant 0 : i32
    %c0_i32_0 = arith.constant 0 : i32
    return %arg0, %c0_i32, %arg1 : i32, i32, i32
  }
  func.func @transform_1(%arg0: i32, %arg1: i32) -> (i32, i32) {
    %c0_i32 = arith.constant 0 : i32
    %c0_i32_0 = arith.constant 0 : i32
    %c0_i32_1 = arith.constant 0 : i32
    return %c0_i32, %c0_i32_0 : i32, i32
  }
  func.func @transform_2(%arg0: i32, %arg1: i32) -> (i32, i32) {
    %c0_i32 = arith.constant 0 : i32
    %c0_i32_0 = arith.constant 0 : i32
    %c0_i32_1 = arith.constant 0 : i32
    return %c0_i32, %c0_i32_0 : i32, i32
  }
  func.func @transform_3(%arg0: i32, %arg1: i32) -> (i32, i32) {
    %c0_i32 = arith.constant 0 : i32
    %c0_i32_0 = arith.constant 0 : i32
    %c0_i32_1 = arith.constant 0 : i32
    return %c0_i32, %c0_i32_0 : i32, i32
  }
  func.func @transform_4(%arg0: i32, %arg1: i32) -> i32 {
    %c0_i32 = arith.constant 0 : i32
    %c0_i32_0 = arith.constant 0 : i32
    return %c0_i32 : i32
  }
  func.func @transform_5(%arg0: i32, %arg1: i32) -> i32 {
    %c0_i32 = arith.constant 0 : i32
    %c0_i32_0 = arith.constant 0 : i32
    return %c0_i32 : i32
  }
  func.func @transform_6(%arg0: i32, %arg1: i32) -> i32 {
    %c0_i32 = arith.constant 0 : i32
    %c0_i32_0 = arith.constant 0 : i32
    return %c0_i32 : i32
  }
  func.func @transform_7(%arg0: i32, %arg1: i32) -> (i32, i32, i32) {
    %c0_i32 = arith.constant 0 : i32
    %c0_i32_0 = arith.constant 0 : i32
    return %arg0, %c0_i32, %arg1 : i32, i32, i32
  }
}

</mosaic_0001>

<bundles_post_ra>
// kernel: tpu_custom_call.1
= control target key start
LH: loop header
LB: loop body
LE: loop exit
PB: predicated region body
PF: predicated region fallthrough
CT: control target
= control target key end

     0   :  { %s1328_s0 = inlined_call_operand.hbm [shape: f32[2,16,256], index: 0, kind: input, shape index: {}]   ;;  %s1329_s1 = inlined_call_operand.vmem [shape: f32[6,16], index: 1, kind: input, shape index: {}]   ;;  %s1330_s2 = inlined_call_operand.vmem [shape: f32[6,1], index: 2, kind: input, shape index: {}]   ;;  %s1331_s3 = inlined_call_operand.vmem [shape: f32[3,6], index: 3, kind: input, shape index: {}]   ;;  %s1332_s4 = inlined_call_operand.vmem [shape: f32[3], index: 4, kind: input, shape index: {}]   ;;  %s1333_s5 = inlined_call_operand.vmem [shape: f32[3], index: 5, kind: input, shape index: {}]   ;;  %s1334_s6 = inlined_call_operand.<no memory space> [shape: f32[1], index: 6, kind: input, shape index: {}]   ;;  %s1335_s7 = inlined_call_operand.hbm [shape: f32[2,16,256], index: 7, kind: output, shape index: {}]  }
   0x1   :  { %1345 = sst [smem:[#allocation17_spill]] %s1332_s4 }
   0x2   :  { %1346 = sst [smem:[#allocation18_spill]] %s1333_s5 }
   0x3   :  { %12 = sst [smem:[#allocation2]] %s1334_s6 }
   0x4   :  { %13 = vsyncpa [#allocation4], 0 }
   0x5   :  { %15 = vsyncpa [#allocation4 + $0x1], 0 }
   0x6   :  { %16 = vsyncpa [#allocation6], 0 }
   0x7   :  { %17 = vsyncpa [#allocation9], 0 }
   0x8   :  { %18 = vsyncpa [#allocation5], 0 }
   0x9   :  { %20 = vsyncpa [#allocation5 + $0x1], 0  ;;  %s1113_s26 = smov 0   ;;  %s1115_s27 = smov 0  }
   0xa   :  { %s1117_s28 = smov 0   ;;  %s1119_s29 = smov 0  }
   0xb   :  { %s1121_s30 = smov 0   ;;  %s1123_s8 = smov 0  }
   0xc LB: > { %1347 = sst [smem:[#allocation15_spill]] %s1058_s8  ;;  %s753_s6 = sadd.s32 4294967295, %s1058_s8   ;;  %s1058_s8 = sphi %s1123_s8, %s26_s8   ;;  %s1054_s30 = sphi %s1121_s30, %s1373_s30   ;;  %s1050_s29 = sphi %s1119_s29, %s1372_s29   ;;  %s1046_s28 = sphi %s1117_s28, %s1371_s28   ;;  %s1042_s27 = sphi %s1115_s27, %s1370_s27   ;;  %s1038_s26 = sphi %s1113_s26, %s1369_s26  }
   0xd   : > { %s754_s9 = sadd.s32 4294967294, %s1058_s8   ;;  %p54_p0 = scmp.ne.s32.totalorder %s1046_s28, %s1042_s27 }
   0xe   : > { %p55_p1 = scmp.eq.s32.totalorder %s1058_s8, 0  ;;  %p60_p2 = scmp.ne.s32.totalorder %s1042_s27, %s1038_s26 }
   0xf   : > { %p1151_p3 = scmp.eq.s32.totalorder %s753_s6, 0  ;;  %p212_p4 = scmp.eq.s32.totalorder %s753_s6, 1 }
  0x10   : > { %p1155_p5 = por %p55_p1, %p54_p0  ;;  %p218_p6 = scmp.eq.s32.totalorder %s754_s9, 1 }
  0x11   : > { %s1348_s11 = scalar_select %p1151_p3, 1, 0 }
  0x12   : > { %p1161_p7 = por %p1151_p3, %p60_p2  ;;  %p1165_p8 = por %p212_p4, %p54_p0 }
  0x13   : > { %p1169_p9 = por %p218_p6, %p60_p2  ;;  %p755_p10 = scmp.ge.s32.totalorder %s1058_s8, 1 }
  0x14   : > { %s1350_s13 = scalar_select %p1161_p7, 1, 0 }
  0x15   : > { %s1351_s14 = scalar_select %p1165_p8, 1, 0 }
  0x16   : > { %s1352_s15 = scalar_select %p1169_p9, 1, 0 }
  0x17   : > { %p225_p11 = scmp.lt.s32.totalorder %s1058_s8, 3  ;;  %s1354_s4 = sld [smem:[#allocation17_spill]] }
  0x18   : > { %1353 = sst [smem:[#allocation16_spill]] %s1352_s15  ;;  %p819_p0 = scmp.lt.s32.totalorder %s1058_s8, 2 }
  0x19   : > { %p1178_p12 = pnand %p755_p10, %p225_p11  ;;  %s1356_s5 = sld [smem:[#allocation18_spill]] }
  0x1a   : > { %p1191_p2 = pnand %p819_p0, %p1155_p5 }
  0x1b   : > { %s1355_s19 = scalar_select %p1178_p12, 1, 0 }
  0x1c   : > { %p802_p1 = pneg %p1178_p12 }
  0x1d   : > { %s247_s18 = sshll.u32 %s1354_s4, 4  ;;  %s248_s18 = int_to_ptr.vmem [resolvable:$true] %s247_s18 }
  0x1e   : > { %s1357_s23 = scalar_select %p1191_p2, 1, 0 }
  0x1f   : > { %s258_s22 = sshll.u32 %s1356_s5, 4  ;;  %p1197_p4 = pnand %p802_p1, %p1151_p3  ;;  %s259_s22 = int_to_ptr.vmem [resolvable:$true] %s258_s22 }
  0x20   : > { %s912_s25 = scalar_lea.vmem %s248_s18, 16  ;;  %p920_p9 = scmp.lt.s32.totalorder %s248_s18, %s248_s18 }
  0x21   : > { %p913_p6 = scmp.ne.s32.totalorder %s248_s18, %s912_s25  ;;  %p914_p10 = pneg %p1197_p4 }
  0x22   : > { %p921_p8 = scmp.lt.s32.totalorder %s912_s25, %s912_s25 }
  0x23   : > { %p915_p11 = pnand %p914_p10, %p913_p6 }
  0x24   : > { %p922_p7 = por %p921_p8, %p920_p9 }
  0x25   : > { %p916_p13 = pneg %p915_p11 }
  0x27   : > { %p923_p5 = pnand %p922_p7, %p916_p13 }
  0x29   : > { %926 = shalt.err (!%p923_p5)
}
  0x2a   : > { %s1060_s6 = smov [#allocation7]   ;;  %s927_s9 = scalar_lea.vmem %s259_s22, 16 }
  0x2b   : > { %805 = dma.vmem_to_smem (!%p1197_p4), %s248_s18, 16, %s1060_s6, [#allocation6]  }
  0x2c   : > { %p928_p0 = scmp.ne.s32.totalorder %s259_s22, %s927_s9  ;;  %p935_p12 = scmp.lt.s32.totalorder %s259_s22, %s259_s22 }
  0x2d   : > { %p936_p2 = scmp.lt.s32.totalorder %s927_s9, %s927_s9 }
  0x2e   : > { %p930_p1 = pnand %p928_p0, %p914_p10 }
  0x2f   : > { %p937_p6 = por %p936_p2, %p935_p12 }
  0x30   : > { %p931_p3 = pneg %p930_p1 }
  0x32   : > { %p938_p11 = pnand %p937_p6, %p931_p3 }
  0x34   : > { %941 = shalt.err (!%p938_p11)
}
  0x35   : > { %s1061_s12 = smov [#allocation8]   ;;  %s38_s16 = sadd.s32 1, %s1054_s30 }
  0x36   : > { %808 = dma.vmem_to_smem (!%p1197_p4), %s259_s22, 16, %s1061_s12, [#allocation9]  }
  0x37   : > { %s272_s17 = sand.u32 1, %s1046_s28   ;;  %p40_p7 = scmp.ge.s32.totalorder %s38_s16, 2 }
  0x38   : > { %s759_s18 = sshll.u32 %s272_s17, 5  ;;  %s788_s20 = sshll.u32 %s1054_s30, 9 }
  0x39   : > { %s1375_s16 = smov (%p40_p7, %s38_s16), 0  ;;  %s284_s24 = scalar_lea.hbm %s1328_s0, %s788_s20 }
  0x3a   : > { %s42_s6 = ssub.s32 %s1054_s30, %s1375_s16  ;;  %s276_s9 = scalar_lea.vmem [#allocation3], %s759_s18 }
  0x3b   : > { %s285_s10 = sshll.u32 %s276_s9, 4  ;;  %p45_p3 = scmp.eq.s32.totalorder %s42_s6, 0  ;;  %s286_s10 = int_to_ptr.vmem [resolvable:$true] %s285_s10 }
  0x3c   : > { %s1359_s4 = sadd.s32 1, %s1046_s28  ;;  %s273_s22 = scalar_lea.sflag [#allocation4], %s272_s17 }
  0x3d   : > { %s1220_s5 = scalar_select %p45_p3, %s1046_s28, %s1359_s4  }
  0x3e   : > { %p1360_p8 = scmp.ne.s32.totalorder %s1357_s23, 0  ;;  %s955_s12 = scalar_lea.vmem %s286_s10, 512 }
  0x3f   : > { %p956_p12 = scmp.ne.s32.totalorder %s286_s10, %s955_s12  ;;  %s1062_s8 = smov [#allocation3]  }
  0x40   : > { %p944_p9 = pneg %p1360_p8  ;;  %s960_s15 = sshll.u32 %s1062_s8, 4  ;;  %s961_s15 = int_to_ptr.vmem [resolvable:$false] %s960_s15 }
  0x41   : > { %s962_s21 = scalar_lea.vmem %s961_s15, 1024  ;;  %p963_p4 = scmp.lt.s32.totalorder %s286_s10, %s961_s15 }
  0x42   : > { %p958_p13 = pnand %p956_p12, %p944_p9  ;;  %p964_p10 = scmp.lt.s32.totalorder %s962_s21, %s955_s12 }
  0x44   : > { %p959_p2 = pneg %p958_p13  ;;  %p965_p5 = por %p964_p10, %p963_p4 }
  0x46   : > { %p966_p0 = pnand %p965_p5, %p959_p2 }
  0x48   : > { %969 = shalt.err (!%p966_p0)
}
  0x49   : > { %s1063_s18 = smov 256   ;;  %s1064_s4 = smov 16  }
  0x4a   : > { %812 = dma.hbm_to_vmem [thread:$0]  (!%p1360_p8), %s284_s24, 512, %s286_s10, %s273_s22, %s1063_s18, %s1063_s18, %s1064_s4  }
  0x4b   : > { %p1361_p1 = scmp.ne.s32.totalorder %s1355_s19, 0 }
  0x4c   : > { %s1229_s17 = sand.u32 (!%p1361_p1), 1, %s1042_s27   ;;  %p1362_p6 = scmp.ne.s32.totalorder (!%p1361_p1), %s1350_s13, 0 }
  0x4d   : > { %297 = sbr.rel (%p1361_p1) target bundleno = 587 (0x24b), region = 48  ;;  %s763_s8 = sshll.u32 (!%p1361_p1), %s1229_s17, 5 }
  0x4e   : > { %s300_s15 = scalar_lea.sflag (!%p1361_p1), [#allocation4], %s1229_s17  ;;  %s303_s20 = scalar_lea.vmem (!%p1361_p1), [#allocation3], %s763_s8 }
  0x52   : > { %1021 = dma.done.wait (%p1362_p6), %s300_s15, 512  }
  0x53   : > { %1023 = vsyncadd (%p1362_p6), %s300_s15, 4294966784  ;;  %p1363_p11 = scmp.ne.s32.totalorder %s1348_s11, 0 }
  0x55   : > { %1025 = dma.done.wait (%p1363_p11), [#allocation6], 16  }
  0x56   : > { %1027 = vsyncadd (%p1363_p11), [#allocation6], 4294967280 }
  0x57   : > { %1029 = dma.done.wait (%p1363_p11), [#allocation9], 16  }
  0x58   : > { %1031 = vsyncadd (%p1363_p11), [#allocation9], 4294967280 }
  0x59   : > { %316 = sfence }
  0x5a   : > { %v1247_v0 = vld [vmem:[%s303_s20 + $0x18] sm:$0xff]  ;;  %v1249_v1 = vld [vmem:[%s303_s20 + $0x10] sm:$0xff]  ;;  %v1251_v2 = vld [vmem:[%s303_s20 + $0x8] sm:$0xff]  ;;  %v1065_v4 = vmov 0.0   ;;  %vm356_vm0 = vcmask 130048   ;;  %v1066_v7 = vmov 0  }
  0x5b   : > { %388 = vmatprep.subr.mxu0 %v1247_v0  ;;  %v1254_v3 = vld [vmem:[%s303_s20] sm:$0xff]  ;;  %424 = vmatprep.mubr.f32.mxu0 %v1065_v4  ;;  %vm442_vm2 = vcmask 1045504   ;;  %vm438_vm4 = vcmask 48128   ;;  %s520_s24 = sld [smem:[#allocation7]]  ;;  %s789_s4 = sshll.u32 %s1050_s29, 9 }
  0x5c   : > { %v350_v5 = vld [vmem:[%s1330_s2] sm:$0x3f]  ;;  %389 = vmatpush1.msra.mxu0 %v1249_v1  ;;  %879 = vset.pattern.permute.xlu0 %v1066_v7  ;;  %s773_s6 = sld [smem:[#allocation7 + $0x1]]  ;;  %s342_s15 = scalar_lea.vmem [#allocation10], %s763_s8 }
  0x5d   : > { %v349_v6 = vld [vmem:[%s1329_s1] sm:$0x3f]  ;;  %390 = vmatprep.subr.mxu0 %v1251_v2  ;;  %353 = vperm.xlu0 %879, %v350_v5   ;;  %s776_s9 = sld [smem:[#allocation7 + $0x2]]  ;;  %s644_s20 = sshll.u32 %s342_s15, 4  ;;  %s1278_s20 = int_to_ptr.vmem [resolvable:$true] %s644_s20 }
  0x5e   : > { %391 = vmatpush1.msra.mxu0 %v1254_v3  ;;  %513 = vmatprep.mubr.f32.mxu1 %v1065_v4  ;;  %v437_v16 = vld [vmem:[%s1331_s3] sm:$0x7]  ;;  %s779_s22 = sld [smem:[#allocation8 + $0x1]]  ;;  %s1276_s11 = scalar_lea.hbm %s1335_s7, %s789_s4 }
  0x5f   : > { %767 = vmatmul.mubr.msk.f32.vlgmr.msra.gmra.mxu0 %vm356_vm0, %v349_v6  ;;  %s568_s12 = sld [smem:[#allocation8]]  ;;  %s629_s29 = scalar_lea.sflag [#allocation5], %s1229_s17 }
  0x60   : > { %s780_s21 = sld [smem:[#allocation8 + $0x2]]  ;;  %s970_s8 = scalar_lea.vmem %s1278_s20, 512 }
  0x61   : > { %v521_v18 = vstv %s520_s24  ;;  %s596_s18 = sld [smem:[#allocation2]]  ;;  %p971_p7 = scmp.ne.s32.totalorder %s1278_s20, %s970_s8 }
  0x62   : > { %v537_v19 = vstv %s773_s6  ;;  %p1364_p3 = scmp.ne.s32.totalorder %s1351_s14, 0  ;;  %s1067_s19 = smov [#allocation10]  }
  0x63   : > { %v553_v20 = vstv %s776_s9  ;;  %s974_s23 = sshll.u32 %s1067_s19, 4  ;;  %s975_s23 = int_to_ptr.vmem [resolvable:$false] %s974_s23 }
  0x64   : > { %v573_v47 = vstv %s779_s22  ;;  %p972_p8 = pnand %p971_p7, %p1364_p3  ;;  %s976_s25 = scalar_lea.vmem %s975_s23, 1024 }
  0x65   : > { %v569_v50 = vstv %s568_s12  ;;  %p977_p12 = scmp.lt.s32.totalorder %s1278_s20, %s975_s23  ;;  %p978_p13 = scmp.lt.s32.totalorder %s976_s25, %s970_s8 }
  0x66   : > { %v585_v53 = vstv %s780_s21  ;;  %p973_p9 = pneg %p972_p8 }
  0x67   : > { %p979_p2 = por %p978_p13, %p977_p12 }
  0x69   : > { %p980_p4 = pnand %p979_p2, %p973_p9 }
  0xd8   : > { %v354_v8 = vpop.permute.xlu0 %353 }
 0x11f   : > { %v426_v9 = vpop.f32.mrf.mxu0 }
 0x120   : > { %v427_v10 = vadd.f32 %v426_v9, %v354_v8 }
 0x121   : > { %v428_v11 = vpop.f32.mrf.mxu0 }
 0x122   : > { %v429_v12 = vadd.f32 %v428_v11, %v354_v8  ;;  %v433_v13 = vmul.f32 0.01, %v427_v10  ;;  %vm431_vm3 = vcmp.ge.f32.partialorder %v427_v10, 0.0  ;;  %v597_v8 = vstv %s596_s18 }
 0x124   : > { %vm432_vm1 = vcmp.ge.f32.partialorder %v429_v12, 0.0  ;;  %v434_v14 = vmul.f32 0.01, %v429_v12  ;;  %v435_v17 = vsel %vm431_vm3, %v427_v10, %v433_v13 }
 0x126   : > { %v436_v15 = vsel %vm432_vm1, %v429_v12, %v434_v14 }
 0x127   : > { %768 = vmatprep.subr.msk.mxu1 %vm442_vm2, %v436_v15 }
 0x128   : > { %769 = vmatpush1.msk.msra.mxu1 %vm442_vm2, %v435_v17 }
 0x129   : > { %770 = vmatmul.mubr.msk.f32.vlgmr.msra.gmra.mxu1 %vm438_vm4, %v437_v16 }
 0x1e9   : > { %v515_v21 = vpop.f32.mrf.mxu1 }
 0x1ea   : > { %v522_v22 = vadd.f32 %v521_v18, %v515_v21  ;;  %v538_v23 = vadd.f32 %v537_v19, %v515_v21  ;;  %v554_v24 = vadd.f32 %v553_v20, %v515_v21 }
 0x1eb   : > { %v517_v25 = vpop.f32.mrf.mxu1 }
 0x1ec   : > { %v523_v26 = vadd.f32 %v521_v18, %v517_v25  ;;  %v771_v27 = vmul.f32 -1.442695, %v522_v22  ;;  %v539_v28 = vadd.f32 %v537_v19, %v517_v25  ;;  %v774_v29 = vmul.f32 -1.442695, %v538_v23 }
 0x1ed   : > { %v555_v30 = vadd.f32 %v553_v20, %v517_v25  ;;  %v777_v33 = vmul.f32 -1.442695, %v554_v24  ;;  %v612_v19 = vlaneseq }
 0x1ee   : > { %880 = vpow2.f32 %v771_v27  ;;  %v772_v31 = vmul.f32 -1.442695, %v523_v26  ;;  %v775_v32 = vmul.f32 -1.442695, %v539_v28 }
 0x1ef   : > { %882 = vpow2.f32 %v774_v29  ;;  %v778_v34 = vmul.f32 -1.442695, %v555_v30  ;;  %v613_v20 = vshrl.u32 %v612_v19, 7 }
 0x1f0   : > { %884 = vpow2.f32 %v772_v31 }
 0x1f1   : > { %886 = vpow2.f32 %v775_v32  ;;  %v614_v21 = vsub.s32 0, %v613_v20 }
 0x1f2   : > { %888 = vpow2.f32 %v777_v33 }
 0x1f3   : > { %890 = vpow2.f32 %v778_v34 }
 0x1fb   : > { %v881_v35 = vpop.eup %880 }
 0x1fc   : > { %v883_v36 = vpop.eup %882  ;;  %v530_v37 = vadd.f32 1.0, %v881_v35 }
 0x1fd   : > { %v885_v38 = vpop.eup %884  ;;  %v546_v39 = vadd.f32 1.0, %v883_v36 }
 0x1fe   : > { %v887_v40 = vpop.eup %886  ;;  %v531_v41 = vadd.f32 1.0, %v885_v38  ;;  %892 = vrcp.f32 %v530_v37 }
 0x1ff   : > { %v889_v42 = vpop.eup %888  ;;  %v547_v43 = vadd.f32 1.0, %v887_v40  ;;  %894 = vrcp.f32 %v546_v39 }
 0x200   : > { %v891_v44 = vpop.eup %890  ;;  %896 = vrcp.f32 %v531_v41  ;;  %v562_v45 = vadd.f32 1.0, %v889_v42 }
 0x201   : > { %898 = vrcp.f32 %v547_v43  ;;  %v563_v46 = vadd.f32 1.0, %v891_v44 }
 0x202   : > { %900 = vrcp.f32 %v562_v45 }
 0x203   : > { %902 = vrcp.f32 %v563_v46 }
 0x20b   : > { %v893_v48 = vpop.eup %892 }
 0x20c   : > { %v895_v49 = vpop.eup %894  ;;  %v570_v56 = vmul.f32 %v893_v48, %v569_v50 }
 0x20d   : > { %v897_v51 = vpop.eup %896  ;;  %v574_v52 = vmul.f32 %v895_v49, %v573_v47 }
 0x20e   : > { %v899_v54 = vpop.eup %898  ;;  %v571_v61 = vmul.f32 %v897_v51, %v569_v50 }
 0x20f   : > { %v901_v55 = vpop.eup %900  ;;  %v575_v57 = vmul.f32 %v899_v54, %v573_v47  ;;  %v578_v58 = vrot.slane %v574_v52, 1 }
 0x210   : > { %v903_v59 = vpop.eup %902  ;;  %v586_v60 = vmul.f32 %v901_v55, %v585_v53 }
 0x211   : > { %v579_v62 = vrot.slane %v575_v57, 1  ;;  %v582_v63 = vadd.f32 %v578_v58, %v570_v56  ;;  %v587_v4 = vmul.f32 %v903_v59, %v585_v53 }
 0x212   : > { %v590_v5 = vrot.slane %v586_v60, 2 }
 0x213   : > { %v583_v6 = vadd.f32 %v579_v62, %v571_v61  ;;  %v591_v7 = vrot.slane %v587_v4, 2 }
 0x214   : > { %v594_v9 = vadd.f32 %v590_v5, %v582_v63 }
 0x215   : > { %v595_v10 = vadd.f32 %v591_v7, %v583_v6 }
 0x216   : > { %v598_v11 = vadd.f32 %v597_v8, %v594_v9 }
 0x217   : > { %v599_v12 = vadd.f32 %v597_v8, %v595_v10 }
 0x218   : > { %v781_v13 = vmul.f32 -1.442695, %v598_v11 }
 0x219   : > { %v782_v14 = vmul.f32 -1.442695, %v599_v12 }
 0x21a   : > { %904 = vpow2.f32 %v781_v13 }
 0x21b   : > { %906 = vpow2.f32 %v782_v14 }
 0x227   : > { %v905_v15 = vpop.eup %904 }
 0x228   : > { %v907_v16 = vpop.eup %906  ;;  %v606_v17 = vadd.f32 1.0, %v905_v15 }
 0x229   : > { %v607_v18 = vadd.f32 1.0, %v907_v16 }
 0x22a   : > { %908 = vrcp.f32 %v606_v17 }
 0x22b   : > { %910 = vrcp.f32 %v607_v18 }
 0x237   : > { %v909_v22 = vpop.eup %908 }
 0x238   : > { %v911_v23 = vpop.eup %910  ;;  %v615_v24 = vrot.slane %v909_v22, %v614_v21 }
 0x239   : > { %v619_v25 = vrot.slane %v911_v23, %v614_v21 }
 0x23a   : > { %v620_v26 = vmul.f32 %v615_v24, %v1254_v3  ;;  %v622_v27 = vmul.f32 %v615_v24, %v1249_v1 }
 0x23b   : > { %v621_v28 = vmul.f32 %v619_v25, %v1251_v2  ;;  %v623_v29 = vmul.f32 %v619_v25, %v1247_v0 }
 0x23c   : > { %624 = vst [vmem:[%s342_s15] sm:$0xff] %v620_v26  ;;  %626 = vst [vmem:[%s342_s15 + $0x10] sm:$0xff] %v622_v27 }
 0x23d   : > { %625 = vst [vmem:[%s342_s15 + $0x8] sm:$0xff] %v621_v28  ;;  %627 = vst [vmem:[%s342_s15 + $0x18] sm:$0xff] %v623_v29 }
 0x23e   : > { %983 = shalt.err (!%p980_p4)
}
 0x23f   : > { %s984_s24 = scalar_lea.hbm %s1276_s11, 512  ;;  %s988_s22 = scalar_lea.hbm %s1335_s7, 1024 }
 0x240   : > { %p985_p10 = scmp.ne.s32.totalorder %s1276_s11, %s984_s24  ;;  %p989_p1 = scmp.lt.s32.totalorder %s1276_s11, %s1335_s7 }
 0x241   : > { %p990_p6 = scmp.lt.s32.totalorder %s988_s22, %s984_s24 }
 0x242   : > { %p986_p5 = pnand %p985_p10, %p1364_p3 }
 0x243   : > { %p991_p11 = por %p990_p6, %p989_p1 }
 0x244   : > { %p987_p0 = pneg %p986_p5 }
 0x246   : > { %p992_p7 = pnand %p991_p11, %p987_p0 }
 0x248   : > { %995 = shalt.err (!%p992_p7)
}
 0x249   : > { %s1068_s18 = smov 256   ;;  %s1069_s4 = smov 16  }
 0x24a   : > { %800 = dma.vmem_to_hbm [thread:$0]  (%p1364_p3), %s1278_s20, 512, %s1276_s11, %s629_s29, %s1068_s18, %s1068_s18, %s1069_s4  }
 0x24b PF: > { %s1365_s15 = sld [smem:[#allocation16_spill]]  ;;  %s659_s13 = sand.u32 1, %s1038_s26  }
 0x24c   : > { %s1366_s10 = sld [smem:[#allocation15_spill]]  ;;  %s660_s8 = scalar_lea.sflag [#allocation5], %s659_s13 }
 0x251   : > { %p1367_p8 = scmp.ne.s32.totalorder %s1365_s15, 0 }
 0x252   : > { %p1368_p9 = scmp.ge.s32.totalorder %s1366_s10, 2 }
 0x254   : > { %p814_p12 = pnand %p1368_p9, %p1367_p8 }
 0x256   : > { %p815_p13 = pneg %p814_p12 }
 0x258   : > { %1033 = dma.done.wait (%p815_p13), %s660_s8, 512  }
 0x259   : > { %1035 = vsyncadd (%p815_p13), %s660_s8, 4294966784  ;;  %s26_s8 = sadd.s32 1, %s1366_s10   ;;  %s1369_s26 = smov %s1042_s27 }
 0x25a   : > { %p23_p2 = scmp.ge.s32.totalorder %s26_s8, 4   ;;  %s1370_s27 = smov %s1046_s28 }
 0x25b   : > { %s1371_s28 = smov %s1220_s5  ;;  %s1372_s29 = smov %s1054_s30 }
 0x25c   : > { %s1373_s30 = smov %s1375_s16  ;;  %25 = sbr.rel (!%p23_p2) target bundleno = 12 (0xc), region = 102 }
 0x261   :  { %665 = vsyncpa [#allocation4], 1 }
 0x262   :  { %667 = vsyncpa [#allocation4 + $0x1], 1 }
 0x263   :  { %668 = vsyncpa [#allocation5], 1 }
 0x264   :  { %670 = vsyncpa [#allocation5 + $0x1], 1 }
 0x265   :  { %671 = vsyncpa [#allocation6], 1 }
 0x266   :  { %673 = vsyncpa [#allocation6 + $0x1], 1 }
 0x267   :  { %674 = vsyncpa [#allocation9], 1 }

</bundles_post_ra>
